<compile_context>
chip_gen: v6e
topology: v6e:2x2x1
jax: 0.10.0
libtpu: 0.0.40
codegen_flags: <defaults>
</compile_context>

<pallas_src>
import functools

import jax
import jax.numpy as jnp
from jax.experimental import pallas as pl
from jax.experimental.pallas import tpu as pltpu


# ---------------------------------------------------------------------------
# Fused Pallas kernel: im2col conv (all filter sizes) + bias + ReLU + masked
# max-pool over the sequence + final FC, for one block of batch rows.
# ---------------------------------------------------------------------------

def fused_textcnn_kernel(lhs_ref, w_ref, b_ref, fcw_ref, fcb_ref, out_ref, *,
                         s_len, b_blk, num_filters, filter_sizes):
    """
    lhs_ref : (b_blk, S, k_max*E) bf16  im2col'd activations for this block
    w_ref   : (k_max*E, 3F)       bf16  fused conv weights (zero padded per k)
    b_ref   : (1, 3F)             f32   fused conv biases
    fcw_ref : (3F, C_pad)         bf16  FC weight (lane padded to 128)
    fcb_ref : (1, C_pad)          f32   FC bias   (lane padded)
    out_ref : (b_blk, C_pad)      f32   padded logits
    """
    k_dim = lhs_ref.shape[-1]
    n_out = w_ref.shape[1]

    # --- all conv branches as ONE K=k_max*E matmul over all positions -------
    # (b_blk, S, K) -> (b_blk*S, K) stays copy-free as long as S is a multiple
    # of the sublane packing (16 for bf16, 8 for f32); S=16 here.
    lhs = lhs_ref[...].reshape(b_blk * s_len, k_dim)
    acc = jnp.dot(lhs, w_ref[...], preferred_element_type=jnp.float32)
    acc = jnp.maximum(acc + b_ref[...], 0.0)       # bias + ReLU, (b_blk*S, 3F)

    # --- validity mask generated in-kernel (static per-branch lengths) ------
    # A size-k filter has S-k+1 valid output rows. Zeroing the invalid tail
    # AFTER the ReLU is max-pool-safe ONLY because ReLU output >= 0.
    row = jax.lax.broadcasted_iota(jnp.int32, (s_len, n_out), 0)
    col = jax.lax.broadcasted_iota(jnp.int32, (s_len, n_out), 1)
    limit = jnp.full((s_len, n_out), s_len - filter_sizes[-1] + 1, jnp.int32)
    for fi in range(len(filter_sizes) - 2, -1, -1):
        limit = jnp.where(col < (fi + 1) * num_filters,
                          s_len - filter_sizes[fi] + 1, limit)
    mask = (row < limit).astype(jnp.float32)       # (S, 3F)

    # --- vectorized masked max-pool over the sequence axis -------------------
    acc3 = acc.reshape(b_blk, s_len, n_out)
    feat = jnp.max(acc3 * mask[None, :, :], axis=1)          # (b_blk, 3F)

    # --- fused final FC (bf16 operands, f32 accumulation) --------------------
    out_ref[...] = (jnp.dot(feat.astype(jnp.bfloat16), fcw_ref[...],
                            preferred_element_type=jnp.float32)
                    + fcb_ref[...])


# ---------------------------------------------------------------------------
# Wrapper
# ---------------------------------------------------------------------------

def _pick_batch_block(batch, seq_len):
    """Pick b_blk so each grid step carries >= ~256 matmul rows (b_blk*S).

    Collapses to a single fat step (b_blk = batch) when there is not enough
    batch for >= 2 such steps: on v7x, sharding tiny steps across the two
    TensorCores is pure per-step (~0.35 us) overhead.
    """
    target_rows = 256                               # v6e/v7x MXU rows (>=128 ok on v5e)
    b_needed = max(1, pl.cdiv(target_rows, seq_len))
    b_needed = pl.cdiv(b_needed, 8) * 8             # sublane-aligned output block
    if batch < 2 * b_needed:
        return batch                                # one fat grid step
    return b_needed


def fused_forward(lhs, w_fused, b_fused, fc_w_pad, fc_b_pad, b_blk,
                  num_filters, filter_sizes):
    """lhs: (B, S, k_max*E) bf16 with B % b_blk == 0 -> padded logits (B, C_pad)."""
    B, S, K = lhs.shape
    n_out = w_fused.shape[1]
    c_pad = fc_w_pad.shape[1]
    n_steps = B // b_blk

    return pl.pallas_call(
        functools.partial(fused_textcnn_kernel, s_len=S, b_blk=b_blk,
                          num_filters=num_filters, filter_sizes=filter_sizes),
        out_shape=jax.ShapeDtypeStruct((B, c_pad), jnp.float32),
        grid=(n_steps,),
        in_specs=[
            pl.BlockSpec((b_blk, S, K), lambda i: (i, 0, 0)),
            # Grid-invariant operands (constant index_map -> fetched once).
            # TODO(synk): single-buffer these (pipeline_mode=pl.Buffered(1)) if
            # num_filters/E are scaled up enough for VMEM headroom to matter;
            # at F=128 the double-buffered footprint is negligible.
            pl.BlockSpec((K, n_out), lambda i: (0, 0)),
            pl.BlockSpec((1, n_out), lambda i: (0, 0)),
            pl.BlockSpec((n_out, c_pad), lambda i: (0, 0)),
            pl.BlockSpec((1, c_pad), lambda i: (0, 0)),
        ],
        out_specs=pl.BlockSpec((b_blk, c_pad), lambda i: (i, 0)),
        compiler_params=pltpu.CompilerParams(
            dimension_semantics=("parallel",)),
    )(lhs, w_fused, b_fused, fc_w_pad, fc_b_pad)


def textcnn_forward(params, x_tokens):
    """Full forward pass. x_tokens: (B, S) int32 token ids -> (B, C) f32."""
    B, S = x_tokens.shape
    ksizes = params["filter_sizes"]
    F = params["num_filters"]
    k_max = max(ksizes)

    # Batch-block selection / padding happens on the TOKEN tensor, before the
    # gather and the k_max-x im2col expansion, so the expanded LHS is never
    # rewritten through HBM just to append a few padding rows.
    b_blk = _pick_batch_block(B, S)
    b_pad = pl.cdiv(B, b_blk) * b_blk
    if b_pad != B:
        pad_ids = jnp.full((b_pad - B, S), params["padding_idx"], x_tokens.dtype)
        x_tokens = jnp.concatenate([x_tokens, pad_ids], axis=0)

    # Embedding lookup (glue / gather).
    # TODO(synk): at realistic B/S/E the gather + im2col could move in-kernel
    # (token ids via PrefetchScalarGridSpec, shifted slices feeding the same
    # K=k_max*E matmul) to avoid the k_max-x LHS expansion in HBM — mainly a
    # v5e (lower HBM BW) roofline win; left to XLA at these sizes.
    emb = params["embedding"][x_tokens]                  # (b_pad, S, E) f32
    E = emb.shape[-1]

    # im2col unfold: lhs[b, i, j*E + e] = emb[b, i+j, e]  (zero past the end).
    emb_pad = jnp.concatenate(
        [emb, jnp.zeros((b_pad, k_max - 1, E), emb.dtype)], axis=1)
    lhs = jnp.concatenate(
        [emb_pad[:, j:j + S, :] for j in range(k_max)], axis=-1)
    lhs = lhs.astype(jnp.bfloat16)                       # MXU-native operands

    # nn.Dropout(0.8) is identity in eval mode; bias/ReLU/max-pool/FC are fused
    # into the kernel.
    logits = fused_forward(lhs, params["w_fused"], params["b_fused"],
                           params["fc_w_pad"], params["fc_b_pad"],
                           b_blk, F, ksizes)
    return logits[:B, :params["num_classes"]]


# ---------------------------------------------------------------------------
# Deterministic parameter construction (torch layouts re-laid-out + fused)
# ---------------------------------------------------------------------------

def init_params(key, n_vocab, embed, num_classes, filter_sizes, num_filters):
    keys = jax.random.split(key, 2 * len(filter_sizes) + 3)
    ki = iter(keys)

    # Embedding table, with padding_idx = n_vocab - 1 zeroed out.
    emb_table = jax.random.normal(next(ki), (n_vocab, embed), jnp.float32) * 0.1
    emb_table = emb_table.at[n_vocab - 1].set(0.0)

    k_max = max(filter_sizes)
    w_blocks, b_blocks = [], []
    for k in filter_sizes:
        # torch Conv2d weight is (F, 1, k, E); stored here as (k, E, F),
        # zero-padded along k to k_max and flattened to (k_max*E, F).
        w = jax.random.normal(next(ki), (k, embed, num_filters),
                              jnp.float32) * 0.05
        b = jax.random.normal(next(ki), (1, num_filters), jnp.float32) * 0.01
        w_pad = jnp.concatenate(
            [w, jnp.zeros((k_max - k, embed, num_filters), jnp.float32)],
            axis=0)
        w_blocks.append(w_pad.reshape(k_max * embed, num_filters))
        b_blocks.append(b)
    # bf16 conv weights: intentional inference-time tolerance vs torch f32.
    w_fused = jnp.concatenate(w_blocks, axis=1).astype(jnp.bfloat16)
    b_fused = jnp.concatenate(b_blocks, axis=1)          # (1, 3F) f32

    in_feat = num_filters * len(filter_sizes)
    # torch Linear weight is (C, in_feat); stored transposed, lane-padded to a
    # multiple of 128 and cast to bf16 (single-pass MXU, half the VMEM/DMA).
    fc_w = jax.random.normal(next(ki), (in_feat, num_classes),
                             jnp.float32) * 0.05
    fc_b = jax.random.normal(next(ki), (1, num_classes), jnp.float32) * 0.01
    c_pad = ((num_classes + 127) // 128) * 128
    fc_w_pad = jnp.zeros((in_feat, c_pad), jnp.float32)
    fc_w_pad = fc_w_pad.at[:, :num_classes].set(fc_w).astype(jnp.bfloat16)
    fc_b_pad = jnp.zeros((1, c_pad), jnp.float32)
    fc_b_pad = fc_b_pad.at[:, :num_classes].set(fc_b)

    return {
        "embedding": emb_table,
        "padding_idx": n_vocab - 1,
        "filter_sizes": tuple(filter_sizes),
        "num_filters": num_filters,
        "num_classes": num_classes,
        "w_fused": w_fused,
        "b_fused": b_fused,
        "fc_w_pad": fc_w_pad,
        "fc_b_pad": fc_b_pad,
    }


# ---------------------------------------------------------------------------
# Main
# ---------------------------------------------------------------------------

if __name__ == "__main__":
    # Small, module-consistent shapes.
    n_vocab = 64
    embed = 32
    num_classes = 5
    filter_sizes = (2, 3, 4)
    num_filters = 128
    batch = 2
    seq_len = 16

    key = jax.random.PRNGKey(0)
    pkey, xkey = jax.random.split(key)

    params = init_params(pkey, n_vocab, embed, num_classes,
                         filter_sizes, num_filters)

    # Token ids in [0, n_vocab); include the padding id as well.
    x = jax.random.randint(xkey, (batch, seq_len), 0, n_vocab, dtype=jnp.int32)
    x = x.at[:, -1].set(n_vocab - 1)  # exercise padding_idx row

    out = textcnn_forward(params, x)
    out = jax.block_until_ready(out)

    assert out.shape == (batch, num_classes), out.shape
    assert out.dtype == jnp.float32, out.dtype
    print("KERNEL_OK")
</pallas_src>

<mosaic_0001>
module attributes {stable_mosaic.version = 11 : i64} {
  func.func @fused_textcnn_kernel(%arg0: i32, %arg1: memref<2x16x128xbf16, #tpu.memory_space<vmem>>, %arg2: memref<128x384xbf16, #tpu.memory_space<vmem>>, %arg3: memref<1x384xf32, #tpu.memory_space<vmem>>, %arg4: memref<384x128xbf16, #tpu.memory_space<vmem>>, %arg5: memref<1x128xf32, #tpu.memory_space<vmem>>, %arg6: memref<2x128xf32, #tpu.memory_space<vmem>>) attributes {dimension_semantics = [#tpu.dimension_semantics<parallel>], iteration_bounds = array<i64: 1>, scalar_prefetch = 0 : i64, scratch_operands = 0 : i64, tpu.core_type = #tpu.core_type<tc>, window_params = [{transform_indices = @transform_0, window_bounds = array<i64: 2, 16, 128>}, {pipeline_mode = #tpu.pipeline_mode<synchronous>, transform_indices = @transform_1, window_bounds = array<i64: 128, 384>}, {pipeline_mode = #tpu.pipeline_mode<synchronous>, transform_indices = @transform_2, window_bounds = array<i64: 1, 384>}, {pipeline_mode = #tpu.pipeline_mode<synchronous>, transform_indices = @transform_3, window_bounds = array<i64: 384, 128>}, {pipeline_mode = #tpu.pipeline_mode<synchronous>, transform_indices = @transform_4, window_bounds = array<i64: 1, 128>}, {transform_indices = @transform_5, window_bounds = array<i64: 2, 128>}]} {
    %c0 = arith.constant 0 : index
    %c0_0 = arith.constant 0 : index
    %c0_1 = arith.constant 0 : index
    %0 = vector.load %arg1[%c0, %c0_0, %c0_1] : memref<2x16x128xbf16, #tpu.memory_space<vmem>>, vector<2x16x128xbf16>
    %1 = vector.shape_cast %0 : vector<2x16x128xbf16> to vector<32x128xbf16>
    %c0_2 = arith.constant 0 : index
    %c0_3 = arith.constant 0 : index
    %2 = vector.load %arg2[%c0_2, %c0_3] : memref<128x384xbf16, #tpu.memory_space<vmem>>, vector<128x384xbf16>
    %cst = arith.constant dense<0.000000e+00> : vector<32x384xf32>
    %3 = tpu.matmul %1, %2, %cst {dimension_numbers = #tpu.dot_dimension_numbers<[1], [0], [0], [1], [0, 0, 1, 1], [], []>} : vector<32x128xbf16>, vector<128x384xbf16>, vector<32x384xf32> -> vector<32x384xf32>
    %c0_4 = arith.constant 0 : index
    %c0_5 = arith.constant 0 : index
    %4 = vector.load %arg3[%c0_4, %c0_5] : memref<1x384xf32, #tpu.memory_space<vmem>>, vector<1x384xf32>
    %5 = vector.broadcast %4 : vector<1x384xf32> to vector<32x384xf32>
    %6 = arith.addf %3, %5 : vector<32x384xf32>
    %cst_6 = arith.constant 0.000000e+00 : f32
    %7 = vector.broadcast %cst_6 : f32 to vector<32x384xf32>
    %8 = arith.maximumf %6, %7 : vector<32x384xf32>
    %9 = tpu.iota {dimensions = array<i32: 0>} : vector<16x384xi32>
    %10 = tpu.iota {dimensions = array<i32: 1>} : vector<16x384xi32>
    %c13_i32 = arith.constant 13 : i32
    %11 = vector.broadcast %c13_i32 : i32 to vector<16x384xi32>
    %c256_i32 = arith.constant 256 : i32
    %12 = vector.broadcast %c256_i32 : i32 to vector<16x384xi32>
    %13 = arith.cmpi slt, %10, %12 : vector<16x384xi32>
    %c14_i32 = arith.constant 14 : i32
    %14 = vector.broadcast %c14_i32 : i32 to vector<16x384xi32>
    %15 = arith.select %13, %14, %11 : vector<16x384xi1>, vector<16x384xi32>
    %c128_i32 = arith.constant 128 : i32
    %16 = vector.broadcast %c128_i32 : i32 to vector<16x384xi32>
    %17 = arith.cmpi slt, %10, %16 : vector<16x384xi32>
    %c15_i32 = arith.constant 15 : i32
    %18 = vector.broadcast %c15_i32 : i32 to vector<16x384xi32>
    %19 = arith.select %17, %18, %15 : vector<16x384xi1>, vector<16x384xi32>
    %20 = arith.cmpi slt, %9, %19 : vector<16x384xi32>
    %21 = arith.extui %20 : vector<16x384xi1> to vector<16x384xi32>
    %22 = arith.sitofp %21 : vector<16x384xi32> to vector<16x384xf32>
    %23 = vector.shape_cast %8 : vector<32x384xf32> to vector<2x16x384xf32>
    %24 = vector.shape_cast %22 : vector<16x384xf32> to vector<1x16x384xf32>
    %25 = vector.broadcast %24 : vector<1x16x384xf32> to vector<2x16x384xf32>
    %26 = arith.mulf %23, %25 : vector<2x16x384xf32>
    %cst_7 = arith.constant dense<0xFF800000> : vector<2x384xf32>
    %27 = vector.multi_reduction <maximumf>, %26, %cst_7 [1] : vector<2x16x384xf32> to vector<2x384xf32>
    %28 = arith.truncf %27 : vector<2x384xf32> to vector<2x384xbf16>
    %c0_8 = arith.constant 0 : index
    %c0_9 = arith.constant 0 : index
    %29 = vector.load %arg4[%c0_8, %c0_9] : memref<384x128xbf16, #tpu.memory_space<vmem>>, vector<384x128xbf16>
    %cst_10 = arith.constant dense<0.000000e+00> : vector<2x128xf32>
    %30 = tpu.matmul %28, %29, %cst_10 {dimension_numbers = #tpu.dot_dimension_numbers<[1], [0], [0], [1], [0, 0, 1, 1], [], []>} : vector<2x384xbf16>, vector<384x128xbf16>, vector<2x128xf32> -> vector<2x128xf32>
    %c0_11 = arith.constant 0 : index
    %c0_12 = arith.constant 0 : index
    %31 = vector.load %arg5[%c0_11, %c0_12] : memref<1x128xf32, #tpu.memory_space<vmem>>, vector<1x128xf32>
    %32 = vector.broadcast %31 : vector<1x128xf32> to vector<2x128xf32>
    %33 = arith.addf %30, %32 : vector<2x128xf32>
    %c0_13 = arith.constant 0 : index
    %c0_14 = arith.constant 0 : index
    %34 = vector.load %arg6[%c0_13, %c0_14] : memref<2x128xf32, #tpu.memory_space<vmem>>, vector<2x128xf32>
    tpu.vector_store %arg6[%c0_13, %c0_14], %33 {strides = array<i32>} : memref<2x128xf32, #tpu.memory_space<vmem>>, vector<2x128xf32>,
    return
  }
  func.func @transform_0(%arg0: i32) -> (i32, i32, i32) {
    %c0_i32 = arith.constant 0 : i32
    %c0_i32_0 = arith.constant 0 : i32
    %c0_i32_1 = arith.constant 0 : i32
    return %arg0, %c0_i32, %c0_i32_0 : i32, i32, i32
  }
  func.func @transform_1(%arg0: i32) -> (i32, i32) {
    %c0_i32 = arith.constant 0 : i32
    %c0_i32_0 = arith.constant 0 : i32
    %c0_i32_1 = arith.constant 0 : i32
    return %c0_i32, %c0_i32_0 : i32, i32
  }
  func.func @transform_2(%arg0: i32) -> (i32, i32) {
    %c0_i32 = arith.constant 0 : i32
    %c0_i32_0 = arith.constant 0 : i32
    %c0_i32_1 = arith.constant 0 : i32
    return %c0_i32, %c0_i32_0 : i32, i32
  }
  func.func @transform_3(%arg0: i32) -> (i32, i32) {
    %c0_i32 = arith.constant 0 : i32
    %c0_i32_0 = arith.constant 0 : i32
    %c0_i32_1 = arith.constant 0 : i32
    return %c0_i32, %c0_i32_0 : i32, i32
  }
  func.func @transform_4(%arg0: i32) -> (i32, i32) {
    %c0_i32 = arith.constant 0 : i32
    %c0_i32_0 = arith.constant 0 : i32
    %c0_i32_1 = arith.constant 0 : i32
    return %c0_i32, %c0_i32_0 : i32, i32
  }
  func.func @transform_5(%arg0: i32) -> (i32, i32) {
    %c0_i32 = arith.constant 0 : i32
    %c0_i32_0 = arith.constant 0 : i32
    return %arg0, %c0_i32 : i32, i32
  }
}

</mosaic_0001>

<bundles_post_ra>
// kernel: tpu_custom_call.1
= control target key start
LH: loop header
LB: loop body
LE: loop exit
PB: predicated region body
PF: predicated region fallthrough
CT: control target
= control target key end

     0   :  { %10 = vsyncpa [#allocation3], 0  ;;  %s1149_s0 = inlined_call_operand.hbm [shape: bf16[2,16,128], index: 0, kind: input, shape index: {}]   ;;  %s1150_s1 = inlined_call_operand.hbm [shape: bf16[128,384], index: 1, kind: input, shape index: {}]   ;;  %s1151_s2 = inlined_call_operand.vmem [shape: f32[1,384], index: 2, kind: input, shape index: {}]   ;;  %s1152_s3 = inlined_call_operand.hbm [shape: bf16[384,128], index: 3, kind: input, shape index: {}]   ;;  %s1153_s4 = inlined_call_operand.vmem [shape: f32[1,128], index: 4, kind: input, shape index: {}]   ;;  %s1154_s5 = inlined_call_operand.hbm [shape: f32[2,128], index: 5, kind: output, shape index: {}]  }
   0x1   :  { %11 = vsyncpa [#allocation6], 0 }
   0x2   :  { %12 = vsyncpa [#allocation4], 0  ;;  %s1075_s18 = smov [#allocation5]  }
   0x3   :  { %s30_s19 = sshll.u32 %s1075_s18, 4  ;;  %s31_s19 = int_to_ptr.vmem [resolvable:$true] %s30_s19 }
   0x4   :  { %s997_s20 = scalar_lea.vmem %s31_s19, 3072  ;;  %p1002_p1 = scmp.lt.s32.totalorder %s31_s19, %s31_s19 }
   0x5   :  { %p998_p0 = scmp.ne.s32.totalorder %s31_s19, %s997_s20  ;;  %p1003_p2 = scmp.lt.s32.totalorder %s997_s20, %s997_s20 }
   0x7   :  { %p1004_p3 = por %p1003_p2, %p1002_p1 }
   0x9   :  { %p1005_p4 = pnand %p1004_p3, %p998_p0 }
   0xb   :  { %1008 = shalt.err (!%p1005_p4)
}
   0xc   :  { %s1076_s21 = smov 192   ;;  %s1077_s22 = smov 12  }
   0xd   :  { %36 = dma.hbm_to_vmem [thread:$0]  %s1150_s1, 3072, %s31_s19, [#allocation6], %s1076_s21, %s1076_s21, %s1077_s22  }
   0xe   :  { %s1078_s25 = smov [#allocation2]  }
   0xf   :  { %s18_s26 = sshll.u32 %s1078_s25, 4  ;;  %s19_s26 = int_to_ptr.vmem [resolvable:$true] %s18_s26 }
  0x10   :  { %s1017_s27 = scalar_lea.vmem %s19_s26, 256  ;;  %p1022_p6 = scmp.lt.s32.totalorder %s19_s26, %s19_s26 }
  0x11   :  { %p1018_p5 = scmp.ne.s32.totalorder %s19_s26, %s1017_s27  ;;  %p1023_p7 = scmp.lt.s32.totalorder %s1017_s27, %s1017_s27 }
  0x13   :  { %p1024_p8 = por %p1023_p7, %p1022_p6 }
  0x15   :  { %p1025_p9 = pnand %p1024_p8, %p1018_p5 }
  0x17   :  { %1028 = shalt.err (!%p1025_p9)
}
  0x18   :  { %s1079_s28 = smov 64   ;;  %s1080_s29 = smov 4  }
  0x19   :  { %24 = dma.hbm_to_vmem [thread:$0]  %s1149_s0, 256, %s19_s26, [#allocation3], %s1079_s28, %s1079_s28, %s1080_s29  }
  0x1a   :  { %s1081_s7 = smov [#allocation7]  }
  0x1b   :  { %s44_s8 = sshll.u32 %s1081_s7, 4  ;;  %s45_s8 = int_to_ptr.vmem [resolvable:$true] %s44_s8 }
  0x1c   :  { %s1037_s1 = scalar_lea.vmem %s45_s8, 3072  ;;  %p1042_p11 = scmp.lt.s32.totalorder %s45_s8, %s45_s8 }
  0x1d   :  { %p1038_p10 = scmp.ne.s32.totalorder %s45_s8, %s1037_s1  ;;  %p1043_p12 = scmp.lt.s32.totalorder %s1037_s1, %s1037_s1 }
  0x1f   :  { %p1044_p13 = por %p1043_p12, %p1042_p11 }
  0x21   :  { %p1045_p0 = pnand %p1044_p13, %p1038_p10 }
  0x23   :  { %1048 = shalt.err (!%p1045_p0)
}
  0x24   :  { %50 = dma.hbm_to_vmem [thread:$0]  %s1152_s3, 3072, %s45_s8, [#allocation6], %s1079_s28, %s1079_s28, %s1080_s29  }
  0x25   :  { %1069 = dma.done.wait [#allocation3], 256  }
  0x26   :  { %1070 = vsyncadd [#allocation3], 4294967040 }
  0x27   :  { %1071 = dma.done.wait [#allocation6], 6144  }
  0x28   :  { %1072 = vsyncadd [#allocation6], 4294961152  ;;  %v1082_v0 = vmov 0   ;;  %v931_v1 = vld [vmem:[#allocation5 + $0xac] ss:$12 sps:$4 sm:$0xff]   ;;  %v963_v19 = vld [vmem:[#allocation2] sm:$0xff]   ;;  %v101_v52 = vlaneseq }
  0x29   :  { %288 = vmatprep.mubr.bf16.mxu0 %v1082_v0  ;;  %v933_v2 = vld [vmem:[#allocation5 + $0xb0] ss:$12 sps:$4 sm:$0xff]   ;;  %256 = vmatprep.subr.bf16.mxu0 %v931_v1  ;;  %v934_v3 = vld [vmem:[#allocation5 + $0xa8] ss:$12 sps:$4 sm:$0xff]   ;;  %v937_v5 = vld [vmem:[#allocation5 + $0x98] ss:$12 sps:$4 sm:$0xff]  }
  0x2a   :  { %880 = vmatprep.subr.bf16.mxu1 %v933_v2  ;;  %v935_v4 = vld [vmem:[#allocation5 + $0x94] ss:$12 sps:$4 sm:$0xff]   ;;  %257 = vmatpush1.bf16.msra.mxu0 %v934_v3  ;;  %v938_v6 = vld [vmem:[#allocation5 + $0x90] ss:$12 sps:$4 sm:$0xff]   ;;  %v942_v9 = vld [vmem:[#allocation5 + $0x78] ss:$12 sps:$4 sm:$0xff]  }
  0x2b   :  { %881 = vmatpush3.bf16.msra.mxu1 %v933_v2  ;;  %258 = vmatprep.subr.bf16.mxu0 %v935_v4  ;;  %v939_v7 = vld [vmem:[#allocation5 + $0x7c] ss:$12 sps:$4 sm:$0xff]   ;;  %v941_v8 = vld [vmem:[#allocation5 + $0x80] ss:$12 sps:$4 sm:$0xff]   ;;  %v943_v10 = vld [vmem:[#allocation5 + $0x64] ss:$12 sps:$4 sm:$0xff]  }
  0x2c   :  { %882 = vmatprep.subr.bf16.mxu1 %v937_v5  ;;  %v945_v11 = vld [vmem:[#allocation5 + $0x68] ss:$12 sps:$4 sm:$0xff]   ;;  %v946_v12 = vld [vmem:[#allocation5 + $0x60] ss:$12 sps:$4 sm:$0xff]   ;;  %v949_v14 = vld [vmem:[#allocation5 + $0x50] ss:$12 sps:$4 sm:$0xff]   ;;  %896 = vmatprep.mubr.bf16.mxu1 %v963_v19 }
  0x2d   :  { %v947_v13 = vld [vmem:[#allocation5 + $0x4c] ss:$12 sps:$4 sm:$0xff]   ;;  %v950_v15 = vld [vmem:[#allocation5 + $0x48] ss:$12 sps:$4 sm:$0xff]   ;;  %v954_v18 = vld [vmem:[#allocation5 + $0x30] ss:$12 sps:$4 sm:$0xff]  }
  0x2e   :  { %259 = vmatpush1.bf16.msra.mxu0 %v938_v6  ;;  %v951_v16 = vld [vmem:[#allocation5 + $0x34] ss:$12 sps:$4 sm:$0xff]   ;;  %v953_v17 = vld [vmem:[#allocation5 + $0x38] ss:$12 sps:$4 sm:$0xff]   ;;  %v955_v20 = vld [vmem:[#allocation5 + $0x1c] ss:$12 sps:$4 sm:$0xff]  }
  0x2f   :  { %883 = vmatpush3.bf16.msra.mxu1 %v937_v5  ;;  %260 = vmatprep.subr.bf16.mxu0 %v939_v7  ;;  %v957_v21 = vld [vmem:[#allocation5 + $0x20] ss:$12 sps:$4 sm:$0xff]   ;;  %v958_v22 = vld [vmem:[#allocation5 + $0x18] ss:$12 sps:$4 sm:$0xff]   ;;  %v961_v24 = vld [vmem:[#allocation5 + $0x8] ss:$12 sps:$4 sm:$0xff]  }
  0x30   :  { %884 = vmatprep.subr.bf16.mxu1 %v941_v8  ;;  %v959_v23 = vld [vmem:[#allocation5 + $0x4] ss:$12 sps:$4 sm:$0xff]   ;;  %v962_v25 = vld [vmem:[#allocation5] ss:$12 sps:$4 sm:$0xff]   ;;  %v964_v26 = vld [vmem:[#allocation2 + $0x8] sm:$0xff]   ;;  %v1083_v28 = vmov 0.0  }
  0x31   :  { %v965_v27 = vld [vmem:[#allocation7 + $0xb8] sm:$0xff]   ;;  %v966_v29 = vld [vmem:[#allocation7 + $0xb0] sm:$0xff]   ;;  %v968_v31 = vld [vmem:[#allocation7 + $0xa8] sm:$0xff]   ;;  %vm1084_vm0 = vmmov 0   ;;  %v102_v53 = vshrl.u32 %v101_v52, 7  ;;  %vm534_vm4 = vcmask 1041409  }
  0x32   :  { %261 = vmatpush1.bf16.msra.mxu0 %v942_v9  ;;  %v967_v30 = vld [vmem:[#allocation7 + $0x78] sm:$0xff]   ;;  %v970_v33 = vld [vmem:[#allocation7 + $0x70] sm:$0xff]   ;;  %v971_v34 = vld [vmem:[#allocation7 + $0xa0] sm:$0xff]   ;;  %s1085_s12 = smov [#allocation8]  }
  0x33   :  { %885 = vmatpush3.bf16.msra.mxu1 %v941_v8  ;;  %262 = vmatprep.subr.bf16.mxu0 %v943_v10  ;;  %v969_v32 = vld [vmem:[#allocation7 + $0x38] sm:$0xff]   ;;  %v972_v35 = vld [vmem:[#allocation7 + $0x30] sm:$0xff]   ;;  %v973_v36 = vld [vmem:[#allocation7 + $0x68] sm:$0xff]   ;;  %v103_v54 = vsub.s32 0, %v102_v53  ;;  %v111_v55 = vsub.s32 2, %v102_v53  ;;  %v107_v57 = vsub.s32 1, %v102_v53 }
  0x34   :  { %886 = vmatprep.subr.bf16.mxu1 %v945_v11  ;;  %v974_v37 = vld [vmem:[#allocation7 + $0x98] sm:$0xff]   ;;  %v975_v38 = vld [vmem:[#allocation7 + $0x28] sm:$0xff]   ;;  %v976_v39 = vld [vmem:[#allocation7 + $0x60] sm:$0xff]   ;;  %v372_v58 = vadd.s32 8, %v102_v53  ;;  %s775_s13 = sshll.u32 %s1085_s12, 4  ;;  %s776_s13 = int_to_ptr.vmem [resolvable:$true] %s775_s13 }
  0x35   :  { %v977_v40 = vld [vmem:[#allocation7 + $0x90] sm:$0xff]   ;;  %v978_v41 = vld [vmem:[#allocation7 + $0x20] sm:$0xff]   ;;  %v979_v42 = vld [vmem:[#allocation7 + $0x58] sm:$0xff]   ;;  %s1049_s14 = scalar_lea.vmem %s776_s13, 32  ;;  %p1054_p2 = scmp.lt.s32.totalorder %s776_s13, %s776_s13 }
  0x36   :  { %263 = vmatpush1.bf16.msra.mxu0 %v946_v12  ;;  %v980_v43 = vld [vmem:[#allocation7 + $0x88] sm:$0xff]   ;;  %v981_v44 = vld [vmem:[#allocation7 + $0x18] sm:$0xff]   ;;  %v982_v45 = vld [vmem:[#allocation7 + $0x50] sm:$0xff]   ;;  %vm392_vm1 = vcmp.lt.s32.totalorder %v372_v58, 15  ;;  %vm394_vm2 = vcmp.lt.s32.totalorder %v372_v58, 13  ;;  %vm393_vm3 = vcmp.lt.s32.totalorder %v372_v58, 14  ;;  %p1050_p1 = scmp.ne.s32.totalorder %s776_s13, %s1049_s14  ;;  %p1055_p3 = scmp.lt.s32.totalorder %s1049_s14, %s1049_s14 }
  0x37   :  { %887 = vmatpush3.bf16.msra.mxu1 %v945_v11  ;;  %264 = vmatprep.subr.bf16.mxu0 %v947_v13  ;;  %v983_v46 = vld [vmem:[#allocation7 + $0x80] sm:$0xff]   ;;  %v984_v47 = vld [vmem:[#allocation7 + $0x10] sm:$0xff]   ;;  %v985_v48 = vld [vmem:[#allocation7 + $0x48] sm:$0xff]   ;;  %v811_v11 = vsel %vm392_vm1, 1.0, %v1083_v28  ;;  %v813_v12 = vsel %vm394_vm2, 1.0, %v1083_v28 }
  0x38   :  { %888 = vmatprep.subr.bf16.mxu1 %v949_v14  ;;  %v986_v49 = vld [vmem:[#allocation7 + $0x8] sm:$0xff]   ;;  %v987_v50 = vld [vmem:[#allocation7 + $0x40] sm:$0xff]   ;;  %v99_v56 = vld [vmem:[%s1151_s2] sm:$0x7]  ;;  %p1056_p4 = por %p1055_p3, %p1054_p2 }
  0x39   :  { %v988_v51 = vld [vmem:[#allocation7] sm:$0xff]   ;;  %v104_v59 = vrot.slane %v99_v56, %v103_v54  ;;  %v112_v61 = vrot.slane %v99_v56, %v111_v55 }
  0x3a   :  { %265 = vmatpush1.bf16.msra.mxu0 %v950_v15  ;;  %p1057_p5 = pnand %p1056_p4, %p1050_p1 }
  0x3b   :  { %889 = vmatpush3.bf16.msra.mxu1 %v949_v14  ;;  %266 = vmatprep.subr.bf16.mxu0 %v951_v16 }
  0x3c   :  { %890 = vmatprep.subr.bf16.mxu1 %v953_v17 }
  0x3e   :  { %267 = vmatpush1.bf16.msra.mxu0 %v954_v18 }
  0x3f   :  { %891 = vmatpush3.bf16.msra.mxu1 %v953_v17  ;;  %268 = vmatprep.subr.bf16.mxu0 %v955_v20 }
  0x40   :  { %892 = vmatprep.subr.bf16.mxu1 %v957_v21 }
  0x42   :  { %269 = vmatpush1.bf16.msra.mxu0 %v958_v22 }
  0x43   :  { %893 = vmatpush3.bf16.msra.mxu1 %v957_v21  ;;  %270 = vmatprep.subr.bf16.mxu0 %v959_v23  ;;  %v812_v21 = vsel %vm393_vm3, 1.0, %v1083_v28 }
  0x44   :  { %894 = vmatprep.subr.bf16.mxu1 %v961_v24 }
  0x46   :  { %271 = vmatpush1.bf16.msra.mxu0 %v962_v25 }
  0x47   :  { %895 = vmatpush3.bf16.msra.mxu1 %v961_v24  ;;  %849 = vmatprep.subr.bf16.mxu0 %v967_v30 }
  0x48   :  { %900 = vmatprep.subr.bf16.mxu1 %v1083_v28 }
  0x49   :  { %289 = vmatmul.mubr.bf16.vlgmr.msra.gmra.mxu0 %v963_v19 }
  0x4a   :  { %897 = vmatmul.mubr.bf16.vlgmr.msra.gmra.mxu1 %v964_v26  ;;  %298 = vmatprep.mubr.bf16.mxu0 %v1082_v0  ;;  %v108_v0 = vrot.slane %v99_v56, %v107_v57 }
  0x4b   :  { %901 = vmatpush3.bf16.msra.mxu1 %v965_v27  ;;  %850 = vmatpush3.bf16.msra.mxu0 %v969_v32 }
  0x4c   :  { %902 = vmatprep.subr.bf16.mxu1 %v1083_v28  ;;  %851 = vmatprep.subr.bf16.mxu0 %v970_v33 }
  0x4d   :  { %916 = vmatprep.mubr.msk.bf16.mxu1 %vm1084_vm0, %v1083_v28 }
  0x4f   :  { %903 = vmatpush3.bf16.msra.mxu1 %v966_v29  ;;  %852 = vmatpush3.bf16.msra.mxu0 %v972_v35 }
  0x50   :  { %904 = vmatprep.subr.bf16.mxu1 %v1083_v28  ;;  %853 = vmatprep.subr.bf16.mxu0 %v973_v36 }
  0x51   :  { %299 = vmatmul.mubr.bf16.gmra.mxu0 %v964_v26 }
  0x53   :  { %905 = vmatpush3.bf16.msra.mxu1 %v968_v31  ;;  %854 = vmatpush3.bf16.msra.mxu0 %v975_v38 }
  0x54   :  { %906 = vmatprep.subr.bf16.mxu1 %v1083_v28  ;;  %855 = vmatprep.subr.bf16.mxu0 %v976_v39 }
  0x57   :  { %907 = vmatpush3.bf16.msra.mxu1 %v971_v34  ;;  %856 = vmatpush3.bf16.msra.mxu0 %v978_v41 }
  0x58   :  { %908 = vmatprep.subr.bf16.mxu1 %v1083_v28  ;;  %857 = vmatprep.subr.bf16.mxu0 %v979_v42 }
  0x5b   :  { %909 = vmatpush3.bf16.msra.mxu1 %v974_v37  ;;  %858 = vmatpush3.bf16.msra.mxu0 %v981_v44 }
  0x5c   :  { %910 = vmatprep.subr.bf16.mxu1 %v1083_v28  ;;  %859 = vmatprep.subr.bf16.mxu0 %v982_v45 }
  0x5f   :  { %911 = vmatpush3.bf16.msra.mxu1 %v977_v40  ;;  %860 = vmatpush3.bf16.msra.mxu0 %v984_v47 }
  0x60   :  { %912 = vmatprep.subr.bf16.mxu1 %v1083_v28  ;;  %861 = vmatprep.subr.bf16.mxu0 %v985_v48 }
  0x63   :  { %913 = vmatpush3.bf16.msra.mxu1 %v980_v43  ;;  %862 = vmatpush3.bf16.msra.mxu0 %v986_v49 }
  0x64   :  { %914 = vmatprep.subr.bf16.mxu1 %v1083_v28  ;;  %863 = vmatprep.subr.bf16.mxu0 %v987_v50 }
  0x67   :  { %915 = vmatpush3.bf16.msra.mxu1 %v983_v46  ;;  %864 = vmatpush3.bf16.msra.mxu0 %v988_v51 }
 0x109   :  { %v290_v60 = vpop.f32.mrf.mxu0 }
 0x10a   :  { %v898_v62 = vpop.f32.mrf.mxu1  ;;  %v291_v3 = vadd.f32 %v290_v60, %v104_v59 }
 0x10b   :  { %v352_v63 = vadd.f32 %v898_v62, %v112_v61  ;;  %v292_v1 = vpop.f32.mrf.mxu0 }
 0x10c   :  { %v343_v2 = vpop.f32.mrf.mxu1  ;;  %v293_v10 = vadd.f32 %v292_v1, %v108_v0  ;;  %v358_v19 = vmax.f32 %v291_v3, 0.0 }
 0x10d   :  { %v344_v4 = vadd.f32 %v343_v2, %v112_v61  ;;  %v294_v5 = vpop.f32.mrf.mxu0  ;;  %v366_v9 = vmax.f32 %v352_v63, 0.0 }
 0x10e   :  { %v899_v6 = vpop.f32.mrf.mxu1  ;;  %v295_v7 = vadd.f32 %v294_v5, %v104_v59  ;;  %v359_v27 = vmax.f32 %v293_v10, 0.0 }
 0x10f   :  { %v355_v8 = vadd.f32 %v899_v6, %v112_v61  ;;  %v296_v13 = vpop.f32.mrf.mxu0  ;;  %v360_v20 = vmax.f32 %v344_v4, 0.0 }
 0x110   :  { %v346_v14 = vpop.f32.mrf.mxu1  ;;  %v361_v15 = vmax.f32 %v295_v7, 0.0  ;;  %v297_v17 = vadd.f32 %v296_v13, %v108_v0 }
 0x111   :  { %v369_v16 = vmax.f32 %v355_v8, 0.0  ;;  %v347_v18 = vadd.f32 %v346_v14, %v112_v61  ;;  %v300_v22 = vpop.f32.mrf.mxu0 }
 0x112   :  { %v410_v23 = vmul.f32 %v811_v11, %v361_v15  ;;  %v362_v25 = vmax.f32 %v297_v17, 0.0  ;;  %v301_v39 = vadd.f32 %v300_v22, %v104_v59 }
 0x113   :  { %v418_v24 = vmul.f32 %v813_v12, %v369_v16  ;;  %v363_v26 = vmax.f32 %v347_v18, 0.0  ;;  %v302_v29 = vpop.f32.mrf.mxu0 }
 0x114   :  { %v419_v30 = vmax.f32 %v358_v19, %v410_v23  ;;  %v411_v32 = vmul.f32 %v812_v21, %v362_v25  ;;  %v303_v45 = vadd.f32 %v302_v29, %v108_v0  ;;  %v364_v52 = vmax.f32 %v301_v39, 0.0 }
 0x115   :  { %v454_v31 = vmax.f32 %v366_v9, %v418_v24  ;;  %v412_v33 = vmul.f32 %v813_v12, %v363_v26  ;;  %v304_v34 = vpop.f32.mrf.mxu0 }
 0x116   :  { %v420_v35 = vrot.slane %v419_v30, 4  ;;  %v426_v37 = vmax.f32 %v359_v27, %v411_v32  ;;  %v305_v40 = vadd.f32 %v304_v34, %v104_v59  ;;  %v365_v58 = vmax.f32 %v303_v45, 0.0 }
 0x117   :  { %v455_v36 = vrot.slane %v454_v31, 4  ;;  %v433_v38 = vmax.f32 %v360_v20, %v412_v33  ;;  %v306_v41 = vpop.f32.mrf.mxu0 }
 0x118   :  { %v421_v28 = vmax.f32 %v419_v30, %v420_v35  ;;  %v427_v43 = vrot.slane %v426_v37, 4  ;;  %v367_v46 = vmax.f32 %v305_v40, 0.0  ;;  %v307_v47 = vadd.f32 %v306_v41, %v108_v0 }
 0x119   :  { %v456_v42 = vmax.f32 %v454_v31, %v455_v36  ;;  %v434_v44 = vrot.slane %v433_v38, 4 }
 0x11a   :  { %v422_v48 = vrot.slane %v421_v28, 2  ;;  %v428_v50 = vmax.f32 %v426_v37, %v427_v43  ;;  %v416_v53 = vmul.f32 %v811_v11, %v367_v46  ;;  %v368_v54 = vmax.f32 %v307_v47, 0.0 }
 0x11b   :  { %v457_v49 = vrot.slane %v456_v42, 2  ;;  %v435_v51 = vmax.f32 %v433_v38, %v434_v44  ;;  %v814_v44 = vld [vmem:[%s1153_s4] ss:$0 sm:$0xff] }
 0x11c   :  { %v429_v56 = vrot.slane %v428_v50, 2  ;;  %v440_v59 = vmax.f32 %v364_v52, %v416_v53  ;;  %v417_v60 = vmul.f32 %v812_v21, %v368_v54  ;;  %v423_v61 = vmax.f32 %v421_v28, %v422_v48 }
 0x11d   :  { %v458_v55 = vmax.f32 %v456_v42, %v457_v49  ;;  %v436_v57 = vrot.slane %v435_v51, 2 }
 0x11e   :  { %v430_v1 = vmax.f32 %v428_v50, %v429_v56  ;;  %v441_v2 = vrot.slane %v440_v59, 4  ;;  %v447_v3 = vmax.f32 %v365_v58, %v417_v60  ;;  %v424_v7 = vrot.slane %v423_v61, 1 }
 0x11f   :  { %v459_v62 = vrot.slane %v458_v55, 1  ;;  %v437_v63 = vmax.f32 %v435_v51, %v436_v57 }
 0x120   :  { %v442_v5 = vmax.f32 %v440_v59, %v441_v2  ;;  %v448_v6 = vrot.slane %v447_v3, 4  ;;  %v431_v10 = vrot.slane %v430_v1, 1  ;;  %v425_v17 = vmax.f32 %v423_v61, %v424_v7 }
 0x121   :  { %v460_v0 = vmax.f32 %v458_v55, %v459_v62  ;;  %v438_v4 = vrot.slane %v437_v63, 1 }
 0x122   :  { %v443_v11 = vrot.slane %v442_v5, 2  ;;  %v449_v12 = vmax.f32 %v447_v3, %v448_v6  ;;  %v432_v21 = vmax.f32 %v430_v1, %v431_v10  ;;  %v461_v26 = vpack.c.bf16 %v425_v17, %v425_v17 }
 0x123   :  { %v466_v8 = vpack.c.bf16 %v460_v0, %v460_v0  ;;  %v439_v9 = vmax.f32 %v437_v63, %v438_v4 }
 0x124   :  { %v444_v15 = vmax.f32 %v442_v5, %v443_v11  ;;  %v450_v16 = vrot.slane %v449_v12, 2  ;;  %v462_v30 = vpack.c.bf16 %v432_v21, %v432_v21  ;;  %v528_v33 = vunpack.c.l.b16 %v461_v26 }
 0x125   :  { %v533_v13 = vunpack.c.l.b16 %v466_v8  ;;  %v463_v14 = vpack.c.bf16 %v439_v9, %v439_v9 }
 0x126   :  { %v445_v19 = vrot.slane %v444_v15, 1  ;;  %v451_v20 = vmax.f32 %v449_v12, %v450_v16  ;;  %v529_v34 = vunpack.c.l.b16 %v462_v30 }
 0x127   :  { %v530_v18 = vunpack.c.l.b16 %v463_v14 }
 0x128   :  { %v446_v23 = vmax.f32 %v444_v15, %v445_v19  ;;  %v452_v24 = vrot.slane %v451_v20, 1 }
 0x129   :  { %v537_v22 = vsel %vm534_vm4, %v533_v13, %v530_v18 }
 0x12a   :  { %v540_v25 = vpack.c.b16 %v537_v22, %v537_v22  ;;  %v464_v27 = vpack.c.bf16 %v446_v23, %v446_v23  ;;  %v453_v29 = vmax.f32 %v451_v20, %v452_v24 }
 0x12c   :  { %917 = vmatmul.mubr.bf16.vlgmr.msra.gmra.mxu1 %v540_v25  ;;  %v531_v31 = vunpack.c.l.b16 %v464_v27  ;;  %v465_v32 = vpack.c.bf16 %v453_v29, %v453_v29 }
 0x12e   :  { %v532_v35 = vunpack.c.l.b16 %v465_v32  ;;  %v535_v36 = vsel %vm534_vm4, %v531_v31, %v528_v33 }
 0x12f   :  { %v538_v39 = vpack.c.b16 %v535_v36, %v535_v36 }
 0x130   :  { %v536_v37 = vsel %vm534_vm4, %v532_v35, %v529_v34 }
 0x131   :  { %v539_v38 = vpack.c.b16 %v536_v37, %v536_v37 }
 0x133   :  { %720 = vmatprep.mubr.bf16.mxu0 %v539_v38 }
 0x134   :  { %721 = vmatmul.mubr.bf16.vlgmr.msra.gmra.mxu0 %v538_v39 }
 0x1ec   :  { %v762_v40 = vpop.f32.mrf.mxu1 }
 0x1ee   :  { %v918_v41 = vpop.f32.mrf.mxu1 }
 0x1f0   :  { %v765_v28 = vpop.f32.mrf.mxu1 }
 0x1f2   :  { %v919_v42 = vpop.f32.mrf.mxu1 }
 0x1f4   :  { %v865_v43 = vpop.f32.mrf.mxu0 }
 0x1f6   :  { %v866_v45 = vpop.f32.mrf.mxu0 }
 0x1f7   :  { %v867_v46 = vadd.f32 %v866_v45, %v865_v43 }
 0x1f8   :  { %v868_v47 = vpop.f32.mrf.mxu0 }
 0x1f9   :  { %v723_v48 = vadd.f32 %v867_v46, %v814_v44 }
 0x1fa   :  { %v869_v49 = vpop.f32.mrf.mxu0 }
 0x1fb   :  { %v763_v50 = vadd.f32 %v762_v40, %v723_v48 }
 0x1fd   :  { %768 = vst [vmem:[#allocation8] sm:$0x3] %v763_v50 }
 0x1fe   :  { %1060 = shalt.err (!%p1057_p5)
}
 0x1ff   :  { %778 = dma.vmem_to_hbm [thread:$0]  %s776_s13, 32, %s1154_s5, [#allocation4]  }
 0x200   :  { %1073 = dma.done.wait [#allocation4], 32  }
 0x201   :  { %1074 = vsyncadd [#allocation4], 4294967264 }
 0x202   :  { %782 = vsyncpa [#allocation3], 1 }
 0x203   :  { %783 = vsyncpa [#allocation6], 1 }
 0x204   :  { %784 = vsyncpa [#allocation4], 1 }

</bundles_post_ra>
